<compile_context>
chip_gen: v7x
topology: tpu7x:2x2x1
jax: 0.10.0
libtpu: 0.0.40
codegen_flags: <defaults>
</compile_context>

<pallas_src>
import math
import functools

import jax
import jax.numpy as jnp
from jax import lax
from jax.experimental import pallas as pl
from jax.experimental.pallas import tpu as pltpu


def _round_up(x, m):
    return (x + m - 1) // m * m


def _device_vmem_bytes():
    """Best-effort VMEM capacity query; 64 MiB fallback (v7x per-TC size)."""
    try:
        info = pltpu.get_tpu_info()
        for attr in ("vmem_capacity_bytes", "vmem_bytes", "vmem_size_bytes"):
            v = getattr(info, attr, None)
            if v:
                return int(v)
    except Exception:
        pass
    return 64 * 1024 * 1024


def _resident_vmem_need(vocab, d_model, t, emb_itemsize, out_itemsize):
    table = vocab * d_model * emb_itemsize            # single copy (Buffered(1))
    out_blocks = 2 * t * d_model * out_itemsize       # double-buffered output
    ids_blocks = 2 * t * 4                            # tiny id column blocks
    onehot = t * vocab * emb_itemsize                 # (T, vocab) intermediate
    acc = t * d_model * 4                             # f32 matmul result
    return table + out_blocks + ids_blocks + onehot + acc


# ---------------------------------------------------------------------------
# Kernel 1: VMEM-resident table, one-hot MXU gather (small vocab).
# ---------------------------------------------------------------------------
def _embed_onehot_kernel(ids_ref, emb_ref, out_ref, *, scale):
    # ids_ref: (T, 1) int32 token ids
    # emb_ref: (vocab, d_model) table, resident in VMEM (constant index_map)
    # out_ref: (T, d_model)
    vocab = emb_ref.shape[0]
    t = out_ref.shape[0]

    ids = ids_ref[...]                                            # (T, 1)
    vocab_iota = lax.broadcasted_iota(jnp.int32, (t, vocab), 1)   # (T, vocab)
    one_hot = (vocab_iota == ids).astype(emb_ref.dtype)           # (T, vocab)

    # Canonical (T, vocab) @ (vocab, d_model); default precision: a 0/1 one-hot
    # against an f32 table is still bit-exact under the bf16 split.
    gathered = jnp.dot(one_hot, emb_ref[...],
                       preferred_element_type=jnp.float32)        # (T, d_model) f32

    out_ref[...] = (gathered * scale).astype(out_ref.dtype)


def _embed_resident_call(flat_ids, emb_table, tokens_per_block, scale, vmem_limit):
    n = flat_ids.shape[0]
    vocab_size, d_model = emb_table.shape
    n_blocks = n // tokens_per_block
    ids_col = flat_ids.reshape(n, 1)                  # (n, 1) -> (T, 1) blocks

    kernel = functools.partial(_embed_onehot_kernel, scale=scale)
    return pl.pallas_call(
        kernel,
        out_shape=jax.ShapeDtypeStruct((n, d_model), emb_table.dtype),
        grid_spec=pltpu.PrefetchScalarGridSpec(
            num_scalar_prefetch=0,
            grid=(n_blocks,),
            in_specs=[
                # Per-block token ids as a sublane-dense (T, 1) column.
                pl.BlockSpec((tokens_per_block, 1), lambda i: (i, 0)),
                # Full table, constant index_map, single-buffered (loaded once).
                pl.BlockSpec((vocab_size, d_model), lambda i: (0, 0),
                             pipeline_mode=pl.Buffered(1)),
            ],
            out_specs=pl.BlockSpec((tokens_per_block, d_model), lambda i: (i, 0)),
        ),
        compiler_params=pltpu.CompilerParams(
            dimension_semantics=("parallel",),
            vmem_limit_bytes=int(vmem_limit),
        ),
    )(ids_col, emb_table)


# ---------------------------------------------------------------------------
# Kernel 2: table in HBM, manual per-row DMA gather with cross-block
# double-buffering (large vocab fallback).
# ---------------------------------------------------------------------------
def _embed_dma_gather_kernel(ids_ref, emb_hbm_ref, out_ref, rows_ref, sems,
                             *, tokens_per_block, scale):
    # ids_ref:     (n_pad,) int32 token ids in SMEM (scalar-prefetched)
    # emb_hbm_ref: (vocab, d_model) table left in HBM (memory_space=pl.ANY)
    # out_ref:     (T, d_model) output block (VMEM)
    # rows_ref:    (2, T, d_model) VMEM scratch (double buffer across blocks)
    # sems:        (2, T) DMA semaphores
    blk = pl.program_id(0)
    n_blk = pl.num_programs(0)
    slot = blk % 2

    def issue_block(block_idx, slot_idx):
        base = block_idx * tokens_per_block
        for t in range(tokens_per_block):           # fully unrolled
            tok = ids_ref[base + t]
            pltpu.make_async_copy(
                emb_hbm_ref.at[pl.ds(tok, 1), :],
                rows_ref.at[slot_idx, pl.ds(t, 1), :],
                sems.at[slot_idx, t],
            ).start()

    # Prime the pipeline on the very first block.  (Cross-block carry => the
    # grid axis is "arbitrary", i.e. one sequential pass, so this is safe.)
    @pl.when(blk == 0)
    def _():
        issue_block(0, 0)

    # Overlap: issue the NEXT block's row gathers before waiting on this one.
    @pl.when(blk + 1 < n_blk)
    def _():
        issue_block(blk + 1, 1 - slot)

    # Wait for this block's rows.  The source slice only has to match the
    # transfer shape ((1, d_model)); dst/sem identify the copy (same idiom as
    # the reference paged-attention kernel).
    for t in range(tokens_per_block):                # fully unrolled
        pltpu.make_async_copy(
            emb_hbm_ref.at[pl.ds(0, 1), :],
            rows_ref.at[slot, pl.ds(t, 1), :],
            sems.at[slot, t],
        ).wait()

    # One dense, lane/sublane-dense scale + store of the whole block.
    out_ref[...] = (rows_ref[slot].astype(jnp.float32) * scale).astype(out_ref.dtype)


def _embed_dma_call(flat_ids, emb_table, tokens_per_block, scale):
    n = flat_ids.shape[0]
    vocab_size, d_model = emb_table.shape
    n_blocks = n // tokens_per_block

    kernel = functools.partial(_embed_dma_gather_kernel,
                               tokens_per_block=tokens_per_block, scale=scale)
    return pl.pallas_call(
        kernel,
        out_shape=jax.ShapeDtypeStruct((n, d_model), emb_table.dtype),
        grid_spec=pltpu.PrefetchScalarGridSpec(
            num_scalar_prefetch=1,                       # all token ids -> SMEM
            grid=(n_blocks,),
            in_specs=[pl.BlockSpec(memory_space=pl.ANY)],    # table stays in HBM
            out_specs=pl.BlockSpec((tokens_per_block, d_model),
                                   lambda i, ids: (i, 0)),
            scratch_shapes=[
                pltpu.VMEM((2, tokens_per_block, d_model), emb_table.dtype),
                pltpu.SemaphoreType.DMA((2, tokens_per_block)),
            ],
        ),
        # "arbitrary": the cross-block double buffer carries state between
        # consecutive grid steps, so the axis must run as a single sequential
        # pass (parallel vs arbitrary is perf-neutral on single-TC chips).
        compiler_params=pltpu.CompilerParams(
            dimension_semantics=("arbitrary",),
        ),
    )(flat_ids, emb_table)


# ---------------------------------------------------------------------------
# Wrapper: InputEmbedding.forward(x) = embedding(x) * sqrt(d_model)
# ---------------------------------------------------------------------------
def input_embedding(ids, emb_table, *, tokens_per_block=256,
                    max_onehot_vocab=2048,
                    force_dma_gather=False):
    """ids: integer array of any shape; emb_table: (vocab, d_model).

    Returns emb_table[ids] * sqrt(d_model), shape ids.shape + (d_model,).
    """
    lead_shape = tuple(ids.shape)
    vocab_size, d_model = emb_table.shape
    n_tok = 1
    for s in lead_shape:
        n_tok *= int(s)
    scale = math.sqrt(float(d_model))

    # Safety clamp: out-of-range ids would otherwise index unchecked.
    # TODO(synk): PyTorch nn.Embedding raises on out-of-range ids; we clamp.
    flat_ids = jnp.clip(jnp.asarray(ids).reshape((n_tok,)).astype(jnp.int32),
                        0, vocab_size - 1)

    # Tokens per grid step: multiple of 8 (sublane-dense blocks), clamped to
    # the (rounded-up) token count.
    t = max(8, (int(tokens_per_block) // 8) * 8)
    t = min(t, _round_up(n_tok, 8))
    n_pad = _round_up(n_tok, t)
    if n_pad != n_tok:
        flat_ids = jnp.concatenate(
            [flat_ids, jnp.zeros((n_pad - n_tok,), jnp.int32)])

    emb_itemsize = emb_table.dtype.itemsize
    need = _resident_vmem_need(vocab_size, d_model, t, emb_itemsize, emb_itemsize)
    budget = int(0.75 * _device_vmem_bytes())          # per-generation headroom
    vmem_limit = min(budget, need + 4 * 1024 * 1024)

    use_resident = ((not force_dma_gather)
                    and vocab_size <= max_onehot_vocab
                    and need + 2 * 1024 * 1024 <= budget)

    if use_resident:
        out_flat = _embed_resident_call(flat_ids, emb_table, t, scale, vmem_limit)
    else:
        # NOTE: all token ids are scalar-prefetched into SMEM; this bounds a
        # single call to a few hundred K tokens, plenty for transformer inputs.
        out_flat = _embed_dma_call(flat_ids, emb_table, t, scale)

    return out_flat[:n_tok].reshape(lead_shape + (d_model,))


if __name__ == "__main__":
    # Small, deterministic synthetic setup (no checkpoint loading).
    d_model = 128
    vocab_size = 64
    batch, seq = 2, 8

    key = jax.random.PRNGKey(0)
    k_emb, k_ids = jax.random.split(key)

    # nn.Embedding default init: N(0, 1)
    emb_table = jax.random.normal(k_emb, (vocab_size, d_model), dtype=jnp.float32)
    ids = jax.random.randint(k_ids, (batch, seq), 0, vocab_size, dtype=jnp.int32)

    # Pure-JAX reference (embedding gather * sqrt(d_model)).
    ref = jnp.take(emb_table, ids, axis=0) * math.sqrt(float(d_model))

    # Path 1 (default for this vocab): VMEM-resident table + one-hot MXU gather.
    out_resident = jax.block_until_ready(input_embedding(ids, emb_table))
    assert out_resident.shape == (batch, seq, d_model)
    assert jnp.allclose(out_resident, ref, atol=1e-4, rtol=1e-4)

    # Path 2: HBM table + double-buffered per-row DMA gather (large-vocab path).
    out_dma = jax.block_until_ready(
        input_embedding(ids, emb_table, force_dma_gather=True))
    assert out_dma.shape == (batch, seq, d_model)
    assert jnp.allclose(out_dma, ref, atol=1e-5, rtol=1e-5)

    print("KERNEL_OK")
</pallas_src>

<mosaic_0001>
module attributes {stable_mosaic.version = 11 : i64} {
  func.func @_embed_onehot_kernel(%arg0: i32, %arg1: memref<16x1xi32, #tpu.memory_space<vmem>>, %arg2: memref<64x128xf32, #tpu.memory_space<vmem>>, %arg3: memref<16x128xf32, #tpu.memory_space<vmem>>) attributes {dimension_semantics = [#tpu.dimension_semantics<parallel>], iteration_bounds = array<i64: 1>, scalar_prefetch = 0 : i64, scratch_operands = 0 : i64, tpu.core_type = #tpu.core_type<tc>, window_params = [{transform_indices = @transform_0, window_bounds = array<i64: 16, 1>}, {pipeline_mode = #tpu.pipeline_mode<synchronous>, transform_indices = @transform_1, window_bounds = array<i64: 64, 128>}, {transform_indices = @transform_2, window_bounds = array<i64: 16, 128>}]} {
    %c0 = arith.constant 0 : index
    %c0_0 = arith.constant 0 : index
    %0 = vector.load %arg1[%c0, %c0_0] : memref<16x1xi32, #tpu.memory_space<vmem>>, vector<16x1xi32>
    %1 = tpu.iota {dimensions = array<i32: 1>} : vector<16x64xi32>
    %2 = vector.broadcast %0 : vector<16x1xi32> to vector<16x64xi32>
    %3 = arith.cmpi eq, %1, %2 : vector<16x64xi32>
    %4 = arith.extui %3 : vector<16x64xi1> to vector<16x64xi32>
    %5 = arith.sitofp %4 : vector<16x64xi32> to vector<16x64xf32>
    %c0_1 = arith.constant 0 : index
    %c0_2 = arith.constant 0 : index
    %6 = vector.load %arg2[%c0_1, %c0_2] : memref<64x128xf32, #tpu.memory_space<vmem>>, vector<64x128xf32>
    %cst = arith.constant dense<0.000000e+00> : vector<16x128xf32>
    %7 = tpu.matmul %5, %6, %cst {dimension_numbers = #tpu.dot_dimension_numbers<[1], [0], [0], [1], [0, 0, 1, 1], [], []>} : vector<16x64xf32>, vector<64x128xf32>, vector<16x128xf32> -> vector<16x128xf32>
    %cst_3 = arith.constant 11.3137083 : f32
    %8 = vector.broadcast %cst_3 : f32 to vector<16x128xf32>
    %9 = arith.mulf %7, %8 : vector<16x128xf32>
    %c0_4 = arith.constant 0 : index
    %c0_5 = arith.constant 0 : index
    %10 = vector.load %arg3[%c0_4, %c0_5] : memref<16x128xf32, #tpu.memory_space<vmem>>, vector<16x128xf32>
    tpu.vector_store %arg3[%c0_4, %c0_5], %9 {strides = array<i32>} : memref<16x128xf32, #tpu.memory_space<vmem>>, vector<16x128xf32>,
    return
  }
  func.func @transform_0(%arg0: i32) -> (i32, i32) {
    %c0_i32 = arith.constant 0 : i32
    %c0_i32_0 = arith.constant 0 : i32
    return %arg0, %c0_i32 : i32, i32
  }
  func.func @transform_1(%arg0: i32) -> (i32, i32) {
    %c0_i32 = arith.constant 0 : i32
    %c0_i32_0 = arith.constant 0 : i32
    %c0_i32_1 = arith.constant 0 : i32
    return %c0_i32, %c0_i32_0 : i32, i32
  }
  func.func @transform_2(%arg0: i32) -> (i32, i32) {
    %c0_i32 = arith.constant 0 : i32
    %c0_i32_0 = arith.constant 0 : i32
    return %arg0, %c0_i32 : i32, i32
  }
}

</mosaic_0001>

<bundles_post_ra>
// kernel: tpu_custom_call.1
= control target key start
LH: loop header
LB: loop body
LE: loop exit
PB: predicated region body
PF: predicated region fallthrough
CT: control target
= control target key end

     0   :  { %7 = vsyncpa [#allocation3], 0  ;;  %s314_s0 = inlined_call_operand.vmem [shape: s32[16,1], index: 0, kind: input, shape index: {}]   ;;  %s315_s1 = inlined_call_operand.hbm [shape: f32[64,128], index: 1, kind: input, shape index: {}]   ;;  %s316_s2 = inlined_call_operand.hbm [shape: f32[16,128], index: 2, kind: output, shape index: {}]  }
   0x1   :  { %8 = vsyncpa [#allocation4], 0  ;;  %s257_s9 = smov [#allocation2]   ;;  %s209_s13 = scalar_lea.hbm %s315_s1, 1024 }
   0x2   :  { %s16_s10 = sshll.u32 %s257_s9, 4  ;;  %p210_p0 = scmp.ne.s32.totalorder %s315_s1, %s209_s13  ;;  %s17_s10 = int_to_ptr.vmem [resolvable:$true] %s16_s10 }
   0x3   :  { %p213_p1 = scmp.lt.u32.totalorder %s209_s13, %s315_s1 }
   0x5   :  { %p215_p2 = pnand %p213_p1, %p210_p0 }
   0x7   :  { %218 = shalt.err (!%p215_p2)
}
   0x8   :  { %s219_s18 = scalar_lea.vmem %s17_s10, 1024  ;;  %p224_p4 = scmp.lt.s32.totalorder %s17_s10, %s17_s10 }
   0x9   :  { %p220_p3 = scmp.ne.s32.totalorder %s17_s10, %s219_s18  ;;  %p225_p5 = scmp.lt.s32.totalorder %s219_s18, %s219_s18 }
   0xb   :  { %p226_p6 = por %p225_p5, %p224_p4 }
   0xd   :  { %p227_p7 = pnand %p226_p6, %p220_p3 }
   0xf   :  { %230 = shalt.err (!%p227_p7)
}
  0x10   :  { %s258_s19 = smov 128   ;;  %s259_s20 = smov 8  }
  0x11   :  { %22 = dma.hbm_to_vmem [thread:$0]  %s315_s1, 1024, %s17_s10, [#allocation3], %s258_s19, %s258_s19, %s259_s20  }
  0x12   :  { %253 = dma.done.wait [#allocation3], 1024  }
  0x13   :  { %254 = vsyncadd [#allocation3], 4294966272  ;;  %v260_v0 = vmov 0   ;;  %v26_v1 = vld [vmem:[%s314_s0] sm:$0xff]  ;;  %v43_v3 = vld [vmem:[#allocation2 + $0x8] sm:$0xff]  ;;  %v28_v15 = vlaneseq  ;;  %vm50_vm0 = vcmask 523264  }
  0x14   :  { %208 = vset.pattern.permute.xlu0 %v260_v0  ;;  %v42_v2 = vld [vmem:[#allocation2] sm:$0xff]  ;;  %v44_v4 = vld [vmem:[#allocation2 + $0x10] sm:$0xff]  ;;  %v45_v5 = vld [vmem:[#allocation2 + $0x18] sm:$0xff]  ;;  %v261_v18 = vmov 0.0  }
  0x15   :  { %31 = vperm.xlu0 %208, %v26_v1   ;;  %v27_v6 = vld [vmem:[%s314_s0 + $0x8] sm:$0xff]  ;;  %v186_v7 = vpack.c.bf16 %v43_v3, %v42_v2  ;;  %v190_v8 = vpack.c.bf16 %v45_v5, %v44_v4  ;;  %v46_v9 = vld [vmem:[#allocation2 + $0x20] sm:$0xff]  ;;  %v48_v12 = vld [vmem:[#allocation2 + $0x30] sm:$0xff]  ;;  %v29_v16 = vand.u32 127, %v28_v15  ;;  %s262_s0 = smov [#allocation5]  }
  0x16   :  { %v47_v10 = vld [vmem:[#allocation2 + $0x28] sm:$0xff]  ;;  %v49_v13 = vld [vmem:[#allocation2 + $0x38] sm:$0xff]  ;;  %s141_s1 = sshll.u32 %s262_s0, 4  ;;  %s142_s1 = int_to_ptr.vmem [resolvable:$true] %s141_s1 }
  0x17   :  { %187 = vmatprep.subr.bf16.mxu0 %v186_v7  ;;  %v194_v11 = vpack.c.bf16 %v47_v10, %v46_v9  ;;  %v198_v14 = vpack.c.bf16 %v49_v13, %v48_v12  ;;  %s231_s27 = scalar_lea.vmem %s142_s1, 256  ;;  %p236_p9 = scmp.lt.s32.totalorder %s142_s1, %s142_s1 }
  0x18   :  { %189 = vmatpush3.bf16.msra.mxu0 %v186_v7  ;;  %p232_p8 = scmp.ne.s32.totalorder %s142_s1, %s231_s27  ;;  %p237_p10 = scmp.lt.s32.totalorder %s231_s27, %s231_s27 }
  0x19   :  { %34 = vperm.xlu0 %208, %v27_v6   ;;  %191 = vmatprep.subr.bf16.mxu0 %v190_v8 }
  0x1a   :  { %p238_p11 = por %p237_p10, %p236_p9 }
  0x1c   :  { %193 = vmatpush3.bf16.msra.mxu0 %v190_v8  ;;  %p239_p12 = pnand %p238_p11, %p232_p8 }
  0x1d   :  { %195 = vmatprep.subr.bf16.mxu0 %v194_v11 }
  0x20   :  { %197 = vmatpush3.bf16.msra.mxu0 %v194_v11 }
  0x21   :  { %199 = vmatprep.subr.bf16.mxu0 %v198_v14 }
  0x24   :  { %201 = vmatpush3.bf16.msra.mxu0 %v198_v14 }
  0x94   :  { %v32_v17 = vpop.permute.xlu0 %31 }
  0x95   :  { %vm36_vm1 = vcmp.eq.s32.totalorder %v29_v16, %v32_v17 }
  0x96   :  { %v153_v19 = vsel %vm36_vm1, 1.0, %v261_v18 }
  0x97   :  { %183 = vmatprep.mubr.msk.f32.mxu0 %vm50_vm0, %v153_v19 }
  0x98   :  { %v35_v20 = vpop.permute.xlu0 %34 }
  0x99   :  { %vm37_vm2 = vcmp.eq.s32.totalorder %v29_v16, %v35_v20 }
  0x9a   :  { %v154_v21 = vsel %vm37_vm2, 1.0, %v261_v18 }
  0x9b   :  { %184 = vmatmul.mubr.msk.f32.vlgmr.msra.gmra.mrb[0].mxu0 %vm50_vm0, %v154_v21 }
 0x16e   :  { %v185_v22 = vpop.f32.mrb[0].mxu0 }
 0x16f   :  { %v133_v23 = vmul.f32 11.313708, %v185_v22  ;;  %v123_v24 = vpop.f32.mrb[1].mxu0 }
 0x170   :  { %v132_v25 = vmul.f32 11.313708, %v123_v24 }
 0x171   :  { %135 = vst [vmem:[#allocation5 + $0x8] sm:$0xff] %v133_v23 }
 0x172   :  { %134 = vst [vmem:[#allocation5] sm:$0xff] %v132_v25 }
 0x173   :  { %242 = shalt.err (!%p239_p12)
}
 0x174   :  { %s243_s30 = scalar_lea.hbm %s316_s2, 256 }
 0x175   :  { %p244_p13 = scmp.ne.s32.totalorder %s316_s2, %s243_s30  ;;  %p247_p0 = scmp.lt.u32.totalorder %s243_s30, %s316_s2 }
 0x177   :  { %p249_p1 = pnand %p247_p0, %p244_p13 }
 0x179   :  { %252 = shalt.err (!%p249_p1)
}
 0x17a   :  { %147 = dma.vmem_to_hbm [thread:$0]  %s142_s1, 256, %s316_s2, [#allocation4], %s258_s19, %s258_s19, %s259_s20  }
 0x17b   :  { %255 = dma.done.wait [#allocation4], 256  }
 0x17c   :  { %256 = vsyncadd [#allocation4], 4294967040 }
 0x17d   :  { %151 = vsyncpa [#allocation3], 1 }
 0x17e   :  { %152 = vsyncpa [#allocation4], 1 }

</bundles_post_ra>
